<compile_context>
chip_gen: v7x
topology: tpu7x:2x2x1
jax: 0.10.0
libtpu: 0.0.40
codegen_flags: <defaults>
</compile_context>

<pallas_src>
import functools
import math

import jax
import jax.numpy as jnp
from jax import lax
from jax.experimental import pallas as pl
from jax.experimental.pallas import tpu as pltpu


def _sce_kernel(pred_ref, true_ref, out_ref, *, taps, k, n, tb, b_total,
                mask_rows, inv_log_n, log_clip):
    pred = pred_ref[...].astype(jnp.float32)      # (tb, n)
    x = true_ref[...].astype(jnp.float32)         # (tb, n)

    if mask_rows:
        # Tail block of a non-dividing batch: zero garbage rows so every row
        # of the computation is finite/deterministic (rows are sliced off by
        # the masked partial store anyway).
        row = lax.broadcasted_iota(jnp.int32, (tb, 1), 0) + pl.program_id(0) * tb
        valid = row < b_total
        pred = jnp.where(valid, pred, 0.0)
        x = jnp.where(valid, x, 0.0)

    # --- F.conv1d(true, gaussian, padding='same') via symmetric masked rolls ---
    # weights[i] = sum_{d=-k..k} taps[k+d] * x[i+d]  (x zero outside [0, n))
    col = lax.broadcasted_iota(jnp.int32, (tb, n), 1)
    weights = taps[k] * x
    for d in range(1, k + 1):
        fwd = pltpu.roll(x, n - d, 1)                     # fwd[i] = x[i + d] (wrapped)
        bwd = pltpu.roll(x, d, 1)                         # bwd[i] = x[i - d] (wrapped)
        fwd = jnp.where(col < n - d, fwd, 0.0)            # kill wrap -> zero pad
        bwd = jnp.where(col >= d, bwd, 0.0)
        weights = weights + taps[k + d] * (fwd + bwd)     # symmetric taps: 1 mul / pair

    # --- log(clip(softmax(pred), 1e-9, 1)) as a clipped log-softmax ---
    m = jnp.max(pred, axis=-1, keepdims=True)
    z = pred - m
    sum_e = jnp.sum(jnp.exp(z), axis=-1, keepdims=True)
    logp = jnp.maximum(z - jnp.log(sum_e), log_clip)      # upper clip at 1 implicit (<=0)

    # --- fused weighted reduction; L1 normalize + /log(N) as per-row scalars ---
    s = jnp.sum(weights * logp, axis=-1, keepdims=True)   # (tb, 1)
    l1 = jnp.sum(jnp.abs(weights), axis=-1, keepdims=True)
    out_ref[...] = -(s / jnp.maximum(l1, 1e-12)) * inv_log_n


def _round_down(x, m):
    return (x // m) * m


def smoothed_cross_entropy_distance(pred, true, *, k=5, sigma=2.0, block_b=None):
    """Pallas equivalent of SmoothedCrossEntropyDistance(k, sigma).forward."""
    assert pred.shape == true.shape and pred.ndim == 2
    B, N = pred.shape
    assert N > 1, "loss divides by log(N); N must be > 1"
    assert sigma > 0.0

    # Gaussian kernel of length 2k+1, normalized to sum 1; baked in as Python
    # constants (no extra input, no Toeplitz).
    raw = [math.exp(-((t / N / sigma) ** 2) / 2.0) for t in range(-k, k + 1)]
    tot = sum(raw)
    taps = tuple(v / tot for v in raw)

    # --- per-generation VMEM budget (v7x: 64 MiB, v5e/v6e: 128 MiB) ---
    try:
        vmem_cap = int(pltpu.get_tpu_info().vmem_capacity_bytes)
    except Exception:  # pragma: no cover - conservative fallback
        vmem_cap = 64 << 20
    if vmem_cap <= 0:
        vmem_cap = 64 << 20
    budget = int(0.70 * vmem_cap)

    row_bytes = N * (pred.dtype.itemsize + true.dtype.itemsize)

    # --- batch tile: big enough to amortize per-step overhead, small enough to
    #     double-buffer in the budget, and giving >= ~8 grid steps when possible
    if block_b is None:
        if B <= 16:
            tb = B                                        # single full-extent block
        else:
            tb_vmem = max(16, budget // (2 * row_bytes))  # double-buffered inputs
            tb_target = max(16, -(-B // 8))               # aim for ~8 grid steps
            tb = min(tb_vmem, tb_target, 1024, B)
            tb = max(16, _round_down(tb, 16))             # bf16-friendly sublanes
            tb = min(tb, _round_down(B, 16))              # block never exceeds array
    else:
        tb = max(1, min(int(block_b), B))

    grid = (pl.cdiv(B, tb),)
    mask_rows = (B % tb) != 0

    vmem_needed = 2 * tb * row_bytes + 2 * tb * 4 + (4 << 20)
    vmem_limit = int(min(max(vmem_needed, 32 << 20), vmem_cap))

    out = pl.pallas_call(
        functools.partial(
            _sce_kernel,
            taps=taps,
            k=k,
            n=N,
            tb=tb,
            b_total=B,
            mask_rows=mask_rows,
            inv_log_n=1.0 / math.log(N),
            log_clip=math.log(1e-9),
        ),
        out_shape=jax.ShapeDtypeStruct((B, 1), jnp.float32),
        grid=grid,
        in_specs=[
            pl.BlockSpec((tb, N), lambda i: (i, 0)),
            pl.BlockSpec((tb, N), lambda i: (i, 0)),
        ],
        out_specs=pl.BlockSpec((tb, 1), lambda i: (i, 0)),
        compiler_params=pltpu.CompilerParams(
            dimension_semantics=("parallel",),
            vmem_limit_bytes=vmem_limit,
        ),
    )(pred, true)
    return out[:, 0]


def _reference(pred, true, *, k=5, sigma=2.0):
    """Pure-JAX reference mirroring the PyTorch module."""
    B, N = pred.shape
    taps = jnp.exp(-((jnp.arange(-k, k + 1, dtype=jnp.float32) / N / sigma) ** 2) / 2.0)
    taps = taps / jnp.sum(taps)
    padded = jnp.pad(true, ((0, 0), (k, k)))
    weights = jnp.stack(
        [jnp.sum(padded[:, i:i + 2 * k + 1] * taps[None, :], axis=-1) for i in range(N)],
        axis=-1,
    )
    l1 = jnp.sum(jnp.abs(weights), axis=-1, keepdims=True)
    tmp_true = weights / jnp.maximum(l1, 1e-12)
    sm = jax.nn.softmax(pred, axis=-1)
    logp = jnp.log(jnp.clip(sm, 1e-9, 1.0))
    return -jnp.sum(tmp_true * logp, axis=-1) / math.log(N)


if __name__ == "__main__":
    key = jax.random.PRNGKey(0)
    k1, k2 = jax.random.split(key)

    # small canonical shapes: batch=8, segments=128, f32
    B, N = 8, 128
    pred = jax.random.normal(k1, (B, N), dtype=jnp.float32)
    true = jax.random.uniform(k2, (B, N), dtype=jnp.float32)

    out = jax.block_until_ready(smoothed_cross_entropy_distance(pred, true, k=5, sigma=2.0))
    ref = _reference(pred, true, k=5, sigma=2.0)
    assert out.shape == (B,)
    assert jnp.allclose(out, ref, rtol=1e-5, atol=1e-5), (out, ref)

    # exercise the non-dividing-grid (partial tail block) and bf16-input paths
    B2 = 20
    k3, k4 = jax.random.split(k1)
    pred2 = jax.random.normal(k3, (B2, N), dtype=jnp.bfloat16)
    true2 = jax.random.uniform(k4, (B2, N), dtype=jnp.float32)
    out2 = jax.block_until_ready(
        smoothed_cross_entropy_distance(pred2, true2, k=5, sigma=2.0, block_b=16))
    ref2 = _reference(pred2.astype(jnp.float32), true2, k=5, sigma=2.0)
    assert out2.shape == (B2,)
    assert jnp.allclose(out2, ref2, rtol=1e-5, atol=1e-5), (out2, ref2)

    print("KERNEL_OK")
</pallas_src>

<mosaic_0001>
module attributes {stable_mosaic.version = 11 : i64} {
  func.func @_sce_kernel(%arg0: i32, %arg1: memref<8x128xf32, #tpu.memory_space<vmem>>, %arg2: memref<8x128xf32, #tpu.memory_space<vmem>>, %arg3: memref<8x1xf32, #tpu.memory_space<vmem>>) attributes {dimension_semantics = [#tpu.dimension_semantics<parallel>], iteration_bounds = array<i64: 1>, scalar_prefetch = 0 : i64, scratch_operands = 0 : i64, tpu.core_type = #tpu.core_type<tc>, window_params = [{transform_indices = @transform_0, window_bounds = array<i64: 8, 128>}, {transform_indices = @transform_1, window_bounds = array<i64: 8, 128>}, {transform_indices = @transform_2, window_bounds = array<i64: 8, 1>}]} {
    %c0 = arith.constant 0 : index
    %c0_0 = arith.constant 0 : index
    %0 = vector.load %arg1[%c0, %c0_0] : memref<8x128xf32, #tpu.memory_space<vmem>>, vector<8x128xf32>
    %c0_1 = arith.constant 0 : index
    %c0_2 = arith.constant 0 : index
    %1 = vector.load %arg2[%c0_1, %c0_2] : memref<8x128xf32, #tpu.memory_space<vmem>>, vector<8x128xf32>
    %2 = tpu.iota {dimensions = array<i32: 1>} : vector<8x128xi32>
    %cst = arith.constant 0.0909160301 : f32
    %3 = vector.broadcast %cst : f32 to vector<8x128xf32>
    %4 = arith.mulf %3, %1 : vector<8x128xf32>
    %c127_i32 = arith.constant 127 : i32
    %5 = tpu.dynamic_rotate %1 by %c127_i32 dim 1 : vector<8x128xf32>, i32 -> vector<8x128xf32>
    %c1_i32 = arith.constant 1 : i32
    %6 = tpu.dynamic_rotate %1 by %c1_i32 dim 1 : vector<8x128xf32>, i32 -> vector<8x128xf32>
    %c127_i32_3 = arith.constant 127 : i32
    %7 = vector.broadcast %c127_i32_3 : i32 to vector<8x128xi32>
    %8 = arith.cmpi slt, %2, %7 : vector<8x128xi32>
    %cst_4 = arith.constant 0.000000e+00 : f32
    %9 = vector.broadcast %cst_4 : f32 to vector<8x128xf32>
    %10 = arith.select %8, %5, %9 : vector<8x128xi1>, vector<8x128xf32>
    %c1_i32_5 = arith.constant 1 : i32
    %11 = vector.broadcast %c1_i32_5 : i32 to vector<8x128xi32>
    %12 = arith.cmpi sge, %2, %11 : vector<8x128xi32>
    %cst_6 = arith.constant 0.000000e+00 : f32
    %13 = vector.broadcast %cst_6 : f32 to vector<8x128xf32>
    %14 = arith.select %12, %6, %13 : vector<8x128xi1>, vector<8x128xf32>
    %15 = arith.addf %10, %14 : vector<8x128xf32>
    %cst_7 = arith.constant 0.0909153297 : f32
    %16 = vector.broadcast %cst_7 : f32 to vector<8x128xf32>
    %17 = arith.mulf %16, %15 : vector<8x128xf32>
    %18 = arith.addf %4, %17 : vector<8x128xf32>
    %c126_i32 = arith.constant 126 : i32
    %19 = tpu.dynamic_rotate %1 by %c126_i32 dim 1 : vector<8x128xf32>, i32 -> vector<8x128xf32>
    %c2_i32 = arith.constant 2 : i32
    %20 = tpu.dynamic_rotate %1 by %c2_i32 dim 1 : vector<8x128xf32>, i32 -> vector<8x128xf32>
    %c126_i32_8 = arith.constant 126 : i32
    %21 = vector.broadcast %c126_i32_8 : i32 to vector<8x128xi32>
    %22 = arith.cmpi slt, %2, %21 : vector<8x128xi32>
    %cst_9 = arith.constant 0.000000e+00 : f32
    %23 = vector.broadcast %cst_9 : f32 to vector<8x128xf32>
    %24 = arith.select %22, %19, %23 : vector<8x128xi1>, vector<8x128xf32>
    %c2_i32_10 = arith.constant 2 : i32
    %25 = vector.broadcast %c2_i32_10 : i32 to vector<8x128xi32>
    %26 = arith.cmpi sge, %2, %25 : vector<8x128xi32>
    %cst_11 = arith.constant 0.000000e+00 : f32
    %27 = vector.broadcast %cst_11 : f32 to vector<8x128xf32>
    %28 = arith.select %26, %20, %27 : vector<8x128xi1>, vector<8x128xf32>
    %29 = arith.addf %24, %28 : vector<8x128xf32>
    %cst_12 = arith.constant 0.090913251 : f32
    %30 = vector.broadcast %cst_12 : f32 to vector<8x128xf32>
    %31 = arith.mulf %30, %29 : vector<8x128xf32>
    %32 = arith.addf %18, %31 : vector<8x128xf32>
    %c125_i32 = arith.constant 125 : i32
    %33 = tpu.dynamic_rotate %1 by %c125_i32 dim 1 : vector<8x128xf32>, i32 -> vector<8x128xf32>
    %c3_i32 = arith.constant 3 : i32
    %34 = tpu.dynamic_rotate %1 by %c3_i32 dim 1 : vector<8x128xf32>, i32 -> vector<8x128xf32>
    %c125_i32_13 = arith.constant 125 : i32
    %35 = vector.broadcast %c125_i32_13 : i32 to vector<8x128xi32>
    %36 = arith.cmpi slt, %2, %35 : vector<8x128xi32>
    %cst_14 = arith.constant 0.000000e+00 : f32
    %37 = vector.broadcast %cst_14 : f32 to vector<8x128xf32>
    %38 = arith.select %36, %33, %37 : vector<8x128xi1>, vector<8x128xf32>
    %c3_i32_15 = arith.constant 3 : i32
    %39 = vector.broadcast %c3_i32_15 : i32 to vector<8x128xi32>
    %40 = arith.cmpi sge, %2, %39 : vector<8x128xi32>
    %cst_16 = arith.constant 0.000000e+00 : f32
    %41 = vector.broadcast %cst_16 : f32 to vector<8x128xf32>
    %42 = arith.select %40, %34, %41 : vector<8x128xi1>, vector<8x128xf32>
    %43 = arith.addf %38, %42 : vector<8x128xf32>
    %cst_17 = arith.constant 0.0909097865 : f32
    %44 = vector.broadcast %cst_17 : f32 to vector<8x128xf32>
    %45 = arith.mulf %44, %43 : vector<8x128xf32>
    %46 = arith.addf %32, %45 : vector<8x128xf32>
    %c124_i32 = arith.constant 124 : i32
    %47 = tpu.dynamic_rotate %1 by %c124_i32 dim 1 : vector<8x128xf32>, i32 -> vector<8x128xf32>
    %c4_i32 = arith.constant 4 : i32
    %48 = tpu.dynamic_rotate %1 by %c4_i32 dim 1 : vector<8x128xf32>, i32 -> vector<8x128xf32>
    %c124_i32_18 = arith.constant 124 : i32
    %49 = vector.broadcast %c124_i32_18 : i32 to vector<8x128xi32>
    %50 = arith.cmpi slt, %2, %49 : vector<8x128xi32>
    %cst_19 = arith.constant 0.000000e+00 : f32
    %51 = vector.broadcast %cst_19 : f32 to vector<8x128xf32>
    %52 = arith.select %50, %47, %51 : vector<8x128xi1>, vector<8x128xf32>
    %c4_i32_20 = arith.constant 4 : i32
    %53 = vector.broadcast %c4_i32_20 : i32 to vector<8x128xi32>
    %54 = arith.cmpi sge, %2, %53 : vector<8x128xi32>
    %cst_21 = arith.constant 0.000000e+00 : f32
    %55 = vector.broadcast %cst_21 : f32 to vector<8x128xf32>
    %56 = arith.select %54, %48, %55 : vector<8x128xi1>, vector<8x128xf32>
    %57 = arith.addf %52, %56 : vector<8x128xf32>
    %cst_22 = arith.constant 0.0909049287 : f32
    %58 = vector.broadcast %cst_22 : f32 to vector<8x128xf32>
    %59 = arith.mulf %58, %57 : vector<8x128xf32>
    %60 = arith.addf %46, %59 : vector<8x128xf32>
    %c123_i32 = arith.constant 123 : i32
    %61 = tpu.dynamic_rotate %1 by %c123_i32 dim 1 : vector<8x128xf32>, i32 -> vector<8x128xf32>
    %c5_i32 = arith.constant 5 : i32
    %62 = tpu.dynamic_rotate %1 by %c5_i32 dim 1 : vector<8x128xf32>, i32 -> vector<8x128xf32>
    %c123_i32_23 = arith.constant 123 : i32
    %63 = vector.broadcast %c123_i32_23 : i32 to vector<8x128xi32>
    %64 = arith.cmpi slt, %2, %63 : vector<8x128xi32>
    %cst_24 = arith.constant 0.000000e+00 : f32
    %65 = vector.broadcast %cst_24 : f32 to vector<8x128xf32>
    %66 = arith.select %64, %61, %65 : vector<8x128xi1>, vector<8x128xf32>
    %c5_i32_25 = arith.constant 5 : i32
    %67 = vector.broadcast %c5_i32_25 : i32 to vector<8x128xi32>
    %68 = arith.cmpi sge, %2, %67 : vector<8x128xi32>
    %cst_26 = arith.constant 0.000000e+00 : f32
    %69 = vector.broadcast %cst_26 : f32 to vector<8x128xf32>
    %70 = arith.select %68, %62, %69 : vector<8x128xi1>, vector<8x128xf32>
    %71 = arith.addf %66, %70 : vector<8x128xf32>
    %cst_27 = arith.constant 0.0908986851 : f32
    %72 = vector.broadcast %cst_27 : f32 to vector<8x128xf32>
    %73 = arith.mulf %72, %71 : vector<8x128xf32>
    %74 = arith.addf %60, %73 : vector<8x128xf32>
    %cst_28 = arith.constant dense<0xFF800000> : vector<8xf32>
    %75 = vector.multi_reduction <maximumf>, %0, %cst_28 [1] : vector<8x128xf32> to vector<8xf32>
    %76 = vector.shape_cast %75 : vector<8xf32> to vector<8x1xf32>
    %77 = vector.broadcast %76 : vector<8x1xf32> to vector<8x128xf32>
    %78 = arith.subf %0, %77 : vector<8x128xf32>
    %79 = math.exp %78 : vector<8x128xf32>
    %cst_29 = arith.constant dense<0.000000e+00> : vector<8xf32>
    %80 = vector.multi_reduction <add>, %79, %cst_29 [1] : vector<8x128xf32> to vector<8xf32>
    %81 = vector.shape_cast %80 : vector<8xf32> to vector<8x1xf32>
    %82 = math.log %81 : vector<8x1xf32>
    %83 = vector.broadcast %82 : vector<8x1xf32> to vector<8x128xf32>
    %84 = arith.subf %78, %83 : vector<8x128xf32>
    %cst_30 = arith.constant -20.7232666 : f32
    %85 = vector.broadcast %cst_30 : f32 to vector<8x128xf32>
    %86 = arith.maximumf %84, %85 : vector<8x128xf32>
    %87 = arith.mulf %74, %86 : vector<8x128xf32>
    %cst_31 = arith.constant dense<0.000000e+00> : vector<8xf32>
    %88 = vector.multi_reduction <add>, %87, %cst_31 [1] : vector<8x128xf32> to vector<8xf32>
    %89 = vector.shape_cast %88 : vector<8xf32> to vector<8x1xf32>
    %90 = math.absf %74 : vector<8x128xf32>
    %cst_32 = arith.constant dense<0.000000e+00> : vector<8xf32>
    %91 = vector.multi_reduction <add>, %90, %cst_32 [1] : vector<8x128xf32> to vector<8xf32>
    %92 = vector.shape_cast %91 : vector<8xf32> to vector<8x1xf32>
    %cst_33 = arith.constant 9.99999996E-13 : f32
    %93 = vector.broadcast %cst_33 : f32 to vector<8x1xf32>
    %94 = arith.maximumf %92, %93 : vector<8x1xf32>
    %95 = arith.divf %89, %94 : vector<8x1xf32>
    %cst_34 = arith.constant 0.000000e+00 : f32
    %96 = vector.broadcast %cst_34 : f32 to vector<8x1xf32>
    %97 = arith.subf %96, %95 : vector<8x1xf32>
    %cst_35 = arith.constant 0.206099287 : f32
    %98 = vector.broadcast %cst_35 : f32 to vector<8x1xf32>
    %99 = arith.mulf %97, %98 : vector<8x1xf32>
    %c0_36 = arith.constant 0 : index
    %c0_37 = arith.constant 0 : index
    %100 = vector.load %arg3[%c0_36, %c0_37] : memref<8x1xf32, #tpu.memory_space<vmem>>, vector<8x1xf32>
    tpu.vector_store %arg3[%c0_36, %c0_37], %99 {strides = array<i32>} : memref<8x1xf32, #tpu.memory_space<vmem>>, vector<8x1xf32>,
    return
  }
  func.func @transform_0(%arg0: i32) -> (i32, i32) {
    %c0_i32 = arith.constant 0 : i32
    %c0_i32_0 = arith.constant 0 : i32
    return %arg0, %c0_i32 : i32, i32
  }
  func.func @transform_1(%arg0: i32) -> (i32, i32) {
    %c0_i32 = arith.constant 0 : i32
    %c0_i32_0 = arith.constant 0 : i32
    return %arg0, %c0_i32 : i32, i32
  }
  func.func @transform_2(%arg0: i32) -> (i32, i32) {
    %c0_i32 = arith.constant 0 : i32
    %c0_i32_0 = arith.constant 0 : i32
    return %arg0, %c0_i32 : i32, i32
  }
}

</mosaic_0001>

<bundles_post_ra>
// kernel: tpu_custom_call.1
= control target key start
LH: loop header
LB: loop body
LE: loop exit
PB: predicated region body
PF: predicated region fallthrough
CT: control target
= control target key end

     0   :  { %7 = vsyncpa [#allocation3], 0  ;;  %s245_s0 = inlined_call_operand.hbm [shape: f32[8,128], index: 0, kind: input, shape index: {}]   ;;  %s246_s1 = inlined_call_operand.hbm [shape: f32[8,128], index: 1, kind: input, shape index: {}]   ;;  %s247_s2 = inlined_call_operand.vmem [shape: f32[8,1], index: 2, kind: output, shape index: {}]  }
   0x1   :  { %8 = vsyncpa [#allocation5], 0  ;;  %s191_s9 = smov [#allocation2]   ;;  %s192_s11 = smov [#allocation4]  }
   0x2   :  { %s15_s10 = sshll.u32 %s191_s9, 4  ;;  %s25_s12 = sshll.u32 %s192_s11, 4  ;;  %s16_s10 = int_to_ptr.vmem [resolvable:$true] %s15_s10  ;;  %s26_s12 = int_to_ptr.vmem [resolvable:$true] %s25_s12 }
   0x3   :  { %s143_s15 = scalar_lea.hbm %s245_s0, 128 }
   0x4   :  { %p144_p0 = scmp.ne.s32.totalorder %s245_s0, %s143_s15  ;;  %p147_p1 = scmp.lt.u32.totalorder %s143_s15, %s245_s0 }
   0x6   :  { %p149_p2 = pnand %p147_p1, %p144_p0 }
   0x8   :  { %152 = shalt.err (!%p149_p2)
}
   0x9   :  { %s153_s20 = scalar_lea.vmem %s16_s10, 128  ;;  %p158_p4 = scmp.lt.s32.totalorder %s16_s10, %s16_s10 }
   0xa   :  { %p154_p3 = scmp.ne.s32.totalorder %s16_s10, %s153_s20  ;;  %p159_p5 = scmp.lt.s32.totalorder %s153_s20, %s153_s20 }
   0xc   :  { %p160_p6 = por %p159_p5, %p158_p4 }
   0xe   :  { %p161_p7 = pnand %p160_p6, %p154_p3 }
  0x10   :  { %164 = shalt.err (!%p161_p7)
}
  0x11   :  { %18 = dma.hbm_to_vmem [thread:$0]  %s245_s0, 128, %s16_s10, [#allocation3]  }
  0x12   :  { %s165_s25 = scalar_lea.hbm %s246_s1, 128 }
  0x13   :  { %p166_p8 = scmp.ne.s32.totalorder %s246_s1, %s165_s25  ;;  %p169_p9 = scmp.lt.u32.totalorder %s165_s25, %s246_s1 }
  0x15   :  { %p171_p10 = pnand %p169_p9, %p166_p8 }
  0x17   :  { %174 = shalt.err (!%p171_p10)
}
  0x18   :  { %s175_s30 = scalar_lea.vmem %s26_s12, 128  ;;  %p180_p12 = scmp.lt.s32.totalorder %s26_s12, %s26_s12 }
  0x19   :  { %p176_p11 = scmp.ne.s32.totalorder %s26_s12, %s175_s30  ;;  %p181_p13 = scmp.lt.s32.totalorder %s175_s30, %s175_s30 }
  0x1b   :  { %p182_p0 = por %p181_p13, %p180_p12 }
  0x1d   :  { %p183_p1 = pnand %p182_p0, %p176_p11 }
  0x1f   :  { %186 = shalt.err (!%p183_p1)
}
  0x20   :  { %28 = dma.hbm_to_vmem [thread:$0]  %s246_s1, 128, %s26_s12, [#allocation5]  }
  0x21   :  { %187 = dma.done.wait [#allocation3], 128  }
  0x22   :  { %188 = vsyncadd [#allocation3], 4294967168 }
  0x23   :  { %189 = dma.done.wait [#allocation5], 128  }
  0x24   :  { %190 = vsyncadd [#allocation5], 4294967168  ;;  %v36_v0 = vld [vmem:[#allocation4] sm:$0xff]  ;;  %v35_v1 = vld [vmem:[#allocation2] sm:$0xff]  ;;  %s193_s4 = smov 127   ;;  %s194_s5 = smov 1   ;;  %v37_v9 = vlaneseq }
  0x25   :  { %95 = vmax.xlane.f32.xlu0 %v35_v1  ;;  %40 = vrot.lane.b32.xlu1 %v36_v0, %s193_s4  ;;  %s195_s6 = smov 2   ;;  %s196_s7 = smov 125   ;;  %v39_v20 = vmul.f32 0.09091603, %v36_v0  ;;  %vm117_vm10 = vcmask 7168  }
  0x26   :  { %s197_s8 = smov 3   ;;  %s198_s9 = smov 124   ;;  %v38_v11 = vand.u32 127, %v37_v9 }
  0x27   :  { %s199_s1 = smov 126   ;;  %s200_s10 = smov 4  }
  0x28   :  { %s201_s11 = smov 123   ;;  %s202_s12 = smov 5   ;;  %vm44_vm0 = vcmp.lt.s32.totalorder %v38_v11, 127  ;;  %vm46_vm1 = vcmp.ge.s32.totalorder %v38_v11, 1  ;;  %vm57_vm2 = vcmp.ge.s32.totalorder %v38_v11, 2  ;;  %vm55_vm3 = vcmp.lt.s32.totalorder %v38_v11, 126 }
  0x29   :  { %42 = vrot.lane.b32.xlu1 %v36_v0, %s194_s5  ;;  %vm66_vm4 = vcmp.lt.s32.totalorder %v38_v11, 125  ;;  %vm68_vm5 = vcmp.ge.s32.totalorder %v38_v11, 3  ;;  %vm77_vm6 = vcmp.lt.s32.totalorder %v38_v11, 124  ;;  %vm79_vm7 = vcmp.ge.s32.totalorder %v38_v11, 4 }
  0x2a   :  { %vm88_vm8 = vcmp.lt.s32.totalorder %v38_v11, 123  ;;  %vm90_vm9 = vcmp.ge.s32.totalorder %v38_v11, 5 }
  0x2d   :  { %53 = vrot.lane.b32.xlu1 %v36_v0, %s195_s6 }
  0x31   :  { %62 = vrot.lane.b32.xlu1 %v36_v0, %s196_s7 }
  0x35   :  { %64 = vrot.lane.b32.xlu1 %v36_v0, %s197_s8 }
  0x39   :  { %73 = vrot.lane.b32.xlu1 %v36_v0, %s198_s9 }
  0x3b   :  { %51 = vrot.lane.b32.xlu0 %v36_v0, %s199_s1 }
  0x3d   :  { %75 = vrot.lane.b32.xlu1 %v36_v0, %s200_s10 }
  0x41   :  { %84 = vrot.lane.b32.xlu1 %v36_v0, %s201_s11 }
  0x97   :  { %v41_v6 = vpop.permute.xlu1 %40 }
  0x98   :  { %v45_v13 = vsel %vm44_vm0, %v41_v6, 0.0 }
  0x9b   :  { %v43_v7 = vpop.permute.xlu1 %42 }
  0x9c   :  { %v47_v14 = vsel %vm46_vm1, %v43_v7, 0.0 }
  0x9d   :  { %v48_v16 = vadd.f32 %v47_v14, %v45_v13 }
  0x9f   :  { %v54_v8 = vpop.permute.xlu1 %53  ;;  %v49_v21 = vmul.f32 0.09091533, %v48_v16 }
  0xa0   :  { %v58_v18 = vsel %vm57_vm2, %v54_v8, 0.0 }
  0xa1   :  { %v50_v26 = vadd.f32 %v49_v21, %v39_v20 }
  0xa3   :  { %v63_v10 = vpop.permute.xlu1 %62 }
  0xa4   :  { %v67_v23 = vsel %vm66_vm4, %v63_v10, 0.0 }
  0xa7   :  { %v65_v12 = vpop.permute.xlu1 %64 }
  0xa8   :  { %v69_v24 = vsel %vm68_vm5, %v65_v12, 0.0 }
  0xa9   :  { %v70_v27 = vadd.f32 %v69_v24, %v67_v23 }
  0xab   :  { %v74_v17 = vpop.permute.xlu1 %73  ;;  %v71_v31 = vmul.f32 0.09090979, %v70_v27 }
  0xac   :  { %v78_v29 = vsel %vm77_vm6, %v74_v17, 0.0 }
  0xaf   :  { %v76_v25 = vpop.permute.xlu1 %75 }
  0xb0   :  { %v80_v30 = vsel %vm79_vm7, %v76_v25, 0.0 }
  0xb1   :  { %v81_v33 = vadd.f32 %v80_v30, %v78_v29 }
  0xb2   :  { %v96_v2 = vpop.xlane.xlu0 %95 }
  0xb3   :  { %v97_v3 = vsub.f32 %v35_v1, %v96_v2  ;;  %v85_v35 = vpop.permute.xlu1 %84  ;;  %v82_v38 = vmul.f32 0.09090493, %v81_v33 }
  0xb4   :  { %v89_v36 = vsel %vm88_vm8, %v85_v35, 0.0 }
  0xb5   :  { %v98_v4 = vmul.f32 1.442695, %v97_v3 }
  0xb6   :  { %v52_v15 = vpop.permute.xlu0 %51 }
  0xb7   :  { %137 = vpow2.f32 %v98_v4  ;;  %v56_v19 = vsel %vm55_vm3, %v52_v15, 0.0 }
  0xb8   :  { %v59_v22 = vadd.f32 %v58_v18, %v56_v19 }
  0xba   :  { %v60_v28 = vmul.f32 0.09091325, %v59_v22 }
  0xbc   :  { %v61_v32 = vadd.f32 %v60_v28, %v50_v26 }
  0xbe   :  { %v72_v37 = vadd.f32 %v71_v31, %v61_v32 }
  0xc0   :  { %v83_v42 = vadd.f32 %v82_v38, %v72_v37 }
  0xc1   :  { %v138_v5 = vpop.eup %137 }
  0xc2   :  { %100 = vadd.xlane.f32.xlu0 %v138_v5 }
  0xd8   :  { %86 = vrot.lane.b32.xlu0 %v36_v0, %s202_s12 }
 0x14f   :  { %v101_v34 = vpop.xlane.xlu0 %100 }
 0x150   :  { %139 = vlog2.f32 %v101_v34 }
 0x153   :  { %v87_v39 = vpop.permute.xlu0 %86 }
 0x154   :  { %v91_v40 = vsel %vm90_vm9, %v87_v39, 0.0 }
 0x155   :  { %v92_v41 = vadd.f32 %v91_v40, %v89_v36 }
 0x157   :  { %v93_v43 = vmul.f32 0.090898685, %v92_v41 }
 0x159   :  { %v94_v44 = vadd.f32 %v93_v43, %v83_v42 }
 0x15a   :  { %v140_v45 = vpop.eup %139 }
 0x15b   :  { %v103_v46 = vmul.f32 0.6931472, %v140_v45  ;;  %v109_v47 = vand.u32 2147483647, %v94_v44 }
 0x15d   :  { %110 = vadd.xlane.f32.xlu1 %v109_v47  ;;  %v104_v48 = vsub.f32 %v97_v3, %v103_v46 }
 0x15f   :  { %v105_v49 = vmax.f32 %v104_v48, -20.723267 }
 0x161   :  { %v106_v50 = vmul.f32 %v105_v49, %v94_v44 }
 0x163   :  { %107 = vadd.xlane.f32.xlu0 %v106_v50 }
 0x1ea   :  { %v111_v51 = vpop.xlane.xlu1 %110 }
 0x1eb   :  { %v112_v52 = vmax.f32 %v111_v51, 1e-12 }
 0x1ed   :  { %141 = vrcp.f32 %v112_v52 }
 0x1f0   :  { %v108_v54 = vpop.xlane.xlu0 %107 }
 0x1f7   :  { %v142_v53 = vpop.eup %141 }
 0x1f8   :  { %v114_v55 = vmul.f32 %v142_v53, %v108_v54 }
 0x1fa   :  { %v115_v56 = vsub.f32 0.0, %v114_v55 }
 0x1fc   :  { %v116_v57 = vmul.f32 0.20609929, %v115_v56 }
 0x1fe   :  { %118 = vst.msk [vmem:[%s247_s2] sm:$0xff] %vm117_vm10, %v116_v57 }
 0x1ff   :  { %123 = vsyncpa [#allocation3], 1 }
 0x200   :  { %124 = vsyncpa [#allocation5], 1 }

</bundles_post_ra>
